<compile_context>
chip_gen: v7x
topology: tpu7x:2x2x1
jax: 0.10.0
libtpu: 0.0.40
codegen_flags: <defaults>
</compile_context>

<pallas_src>
import functools

import numpy as np

import jax
import jax.numpy as jnp
from jax import lax
from jax.experimental import pallas as pl
from jax.experimental.pallas import tpu as pltpu


def _round_up(x, m):
    return (x + m - 1) // m * m


def _angular_kernel(al_ref, bl_ref, a_ref, p_ref, b_ref, ibn_ref, out_ref, *,
                    tan2, lam):
    """One anchor tile per grid step; raw bf16 batch is resident across the grid."""
    eps2 = 1e-24  # == (1e-12)^2, matches F.normalize eps on the norm.

    a = a_ref[...]            # (tn, Dp) f32 anchors
    p = p_ref[...]            # (tn, Dp) f32 positives
    al = al_ref[...]          # (tn, 1)  int32 anchor labels  (-1 on padded rows)
    bl = bl_ref[...]          # (1, Bp)  int32 batch labels   (-1 on padded cols)
    braw = b_ref[...]         # (Bp, Dp) bf16 raw batch (resident)
    inv_bn = ibn_ref[...]     # (1, Bp)  f32 1/||batch_row||  (resident)

    # --- row normalization of anchors / positives (EUP rsqrt, f32 math) ------
    inv_a = lax.rsqrt(jnp.maximum(jnp.sum(a * a, axis=1, keepdims=True), eps2))
    inv_p = lax.rsqrt(jnp.maximum(jnp.sum(p * p, axis=1, keepdims=True), eps2))
    n_a = a * inv_a
    n_p = p * inv_p

    # --- 0/1 negative mask built in-kernel from labels (VPU compares) --------
    # valid negative = different class AND both labels are real (>= 0).
    mask = jnp.where((al != bl) & (al >= 0) & (bl >= 0), 1.0, 0.0)   # (tn, Bp)

    # --- single fused MXU matmul against the raw batch (bf16 operands) -------
    tn = a.shape[0]
    lhs = jnp.concatenate([a, n_a + n_p], axis=0).astype(jnp.bfloat16)  # (2tn, Dp)
    dims = (((1,), (1,)), ((), ()))          # contract embedding dim (RHS transposed)
    scores = lax.dot_general(lhs, braw, dims,
                             preferred_element_type=jnp.float32)        # (2tn, Bp)
    s_np = scores[:tn, :]                    # <a, neg>           (raw batch rows)
    s_ang = scores[tn:, :] * inv_bn          # <n_a+n_p, n_neg>   (fold 1/||neg||)

    # --- angular term ---------------------------------------------------------
    t2 = 2.0 * (1.0 + tan2) * jnp.sum(n_a * n_p, axis=1, keepdims=True)
    sum_ang = jnp.sum(jnp.exp(4.0 * tan2 * s_ang - t2) * mask,
                      axis=1, keepdims=True)
    ang_log = jnp.log(sum_ang + 1.0)         # (tn, 1); padded rows -> log(1) = 0

    # --- n-pair term:  <a, neg> - <a, p>  -------------------------------------
    ap = jnp.sum(a * p, axis=1, keepdims=True)
    inner_np = jnp.clip(s_np - ap, -50.0, 50.0)
    sum_np = jnp.sum(jnp.exp(inner_np) * mask, axis=1, keepdims=True)
    np_log = jnp.log(sum_np + 1.0)           # (tn, 1)

    # per-tile partial sum, written to this tile's own lane-dense output block.
    partial = jnp.sum(np_log + lam * ang_log, keepdims=True)            # (1, 1)
    out_ref[...] = jnp.broadcast_to(partial, (8, 128))


def _build_pallas_call(kernel, grid, tn, Dp, Bp, vmem_limit, single_buffer_resident):
    if single_buffer_resident:
        def res_spec(shape):
            return pl.BlockSpec(shape, lambda i: (0, 0),
                                pipeline_mode=pl.Buffered(1))
    else:
        def res_spec(shape):
            return pl.BlockSpec(shape, lambda i: (0, 0))

    return pl.pallas_call(
        kernel,
        out_shape=jax.ShapeDtypeStruct((grid * 8, 128), jnp.float32),
        grid=(grid,),
        in_specs=[
            pl.BlockSpec((tn, 1), lambda i: (i, 0)),     # anchor labels tile
            res_spec((1, Bp)),                           # batch labels (resident)
            pl.BlockSpec((tn, Dp), lambda i: (i, 0)),    # anchors tile
            pl.BlockSpec((tn, Dp), lambda i: (i, 0)),    # positives tile
            res_spec((Bp, Dp)),                          # raw batch bf16 (resident)
            res_spec((1, Bp)),                           # 1/||batch_row|| (resident)
        ],
        out_specs=pl.BlockSpec((8, 128), lambda i: (i, 0)),
        compiler_params=pltpu.CompilerParams(
            dimension_semantics=("parallel",),           # megacore-safe: disjoint outputs
            vmem_limit_bytes=vmem_limit),
    )


def angular_loss_pallas(batch, labels, anchor_idx, positive_idx, *,
                        alpha_deg=45.0, lam=2.0, l2_weight=0.005, block_n=256):
    """batch: (B, D) float; labels: (B,) int; anchor/positive_idx: (N,) int."""
    batch = batch.astype(jnp.float32)
    labels = labels.astype(jnp.int32)
    B, D = batch.shape
    N = int(anchor_idx.shape[0])
    tan2 = float(np.tan(np.pi / 180.0 * alpha_deg) ** 2)

    Dp = _round_up(D, 128)                       # contraction dim -> lane aligned
    Bp = _round_up(B, 128)                       # score columns   -> lane dense
    tn = min(_round_up(int(block_n), 8), _round_up(N, 8))
    Np = _round_up(N, tn)
    G = Np // tn

    # gather glue (index selection / sampling) stays in plain JAX; pad with jnp.pad.
    anchors = batch[anchor_idx]
    positives = batch[positive_idx]
    a_pad = jnp.pad(anchors, ((0, Np - N), (0, Dp - D)))
    p_pad = jnp.pad(positives, ((0, Np - N), (0, Dp - D)))
    b_pad = jnp.pad(batch, ((0, Bp - B), (0, Dp - D))).astype(jnp.bfloat16)
    al_pad = jnp.pad(labels[anchor_idx], (0, Np - N),
                     constant_values=-1).reshape(Np, 1)
    bl_pad = jnp.pad(labels, (0, Bp - B), constant_values=-1).reshape(1, Bp)

    # tiny wrapper-side ops: batch row norms (for the angular column scaling and
    # the L2 regularizer, which now lives entirely in the wrapper).
    row_norm = jnp.sqrt(jnp.sum(batch * batch, axis=1))             # (B,)
    inv_bn = jnp.pad(1.0 / jnp.maximum(row_norm, 1e-12),
                     (0, Bp - B)).reshape(1, Bp)

    kernel = functools.partial(_angular_kernel, tan2=tan2, lam=float(lam))

    # VMEM budget: resident batch (bf16) + resident label/norm rows, double-buffered
    # anchor/positive/label tiles, (2tn, Bp) score/exp temporaries, output blocks.
    resident = Bp * Dp * 2 + 2 * Bp * 4
    streamed = 2 * (2 * tn * Dp * 4 + tn * 4)
    temps = 2 * tn * Dp * 2 + 4 * (2 * tn * Bp * 4)
    budget = 2 * resident + streamed + temps + 2 * 8 * 128 * 4 + (8 << 20)
    vmem_limit = int(min(max(budget, 16 << 20), 100 << 20))
    # TODO(synk): on v7x (64 MiB VMEM) cap the requested limit near ~56 MiB and
    # shrink tn if the budget above exceeds it.

    args = (al_pad, bl_pad, a_pad, p_pad, b_pad, inv_bn)
    try:
        partials = _build_pallas_call(kernel, G, tn, Dp, Bp, vmem_limit,
                                      single_buffer_resident=True)(*args)
        partials = jax.block_until_ready(partials)
    except Exception:
        # Fallback for JAX versions where pipeline_mode=pl.Buffered(1) is not
        # supported on pallas_call's implicit pipeline.
        partials = _build_pallas_call(kernel, G, tn, Dp, Bp, vmem_limit,
                                      single_buffer_resident=False)(*args)

    core = jnp.sum(partials[::8, 0]) / float(N)       # one partial per grid step
    l2 = float(l2_weight) * jnp.mean(row_norm)
    return core + l2


def angular_loss_ref(anchors, positives, negatives, batch, *,
                     alpha_deg=45.0, lam=2.0, l2_weight=0.005):
    """Plain-JAX reference mirroring the PyTorch forward (exact f32 elementwise)."""
    tan2 = np.tan(np.pi / 180.0 * alpha_deg) ** 2

    def _norm(x):
        return x / jnp.maximum(jnp.linalg.norm(x, axis=-1, keepdims=True), 1e-12)

    n_a, n_p, n_n = _norm(anchors), _norm(positives), _norm(negatives)
    t1 = 4.0 * tan2 * jnp.sum((n_a + n_p)[:, None, :] * n_n, axis=-1)
    t2 = 2.0 * (1.0 + tan2) * jnp.sum(n_a * n_p, axis=-1, keepdims=True)
    ang = jnp.mean(jnp.log(jnp.sum(jnp.exp(t1 - t2), axis=1) + 1.0))
    inp = jnp.sum(anchors[:, None, :] * (negatives - positives[:, None, :]), axis=-1)
    npair = jnp.mean(jnp.log(jnp.sum(jnp.exp(jnp.clip(inp, -50.0, 50.0)), axis=1) + 1.0))
    l2 = jnp.mean(jnp.linalg.norm(batch, axis=1))
    return npair + lam * ang + l2_weight * l2


def _npair_sampling(labels):
    """Deterministic 'npair' sampling glue: anchor = first of each class pair,
    positive = second, negatives = all samples from other classes."""
    labels = np.asarray(labels)
    classes = np.unique(labels)
    anchors, positives, negatives = [], [], []
    for c in classes:
        idx = np.where(labels == c)[0]
        anchors.append(int(idx[0]))
        positives.append(int(idx[1]))
        negatives.append(np.where(labels != c)[0].tolist())
    return (np.asarray(anchors, np.int32),
            np.asarray(positives, np.int32),
            np.asarray(negatives, np.int32))


if __name__ == "__main__":
    # Deterministic synthetic setup: B=32 samples, D=32 dims, 16 classes x 2.
    key = jax.random.PRNGKey(0)
    B, D = 32, 32
    labels = np.repeat(np.arange(16, dtype=np.int32), 2)            # (32,)
    batch = jax.random.normal(key, (B, D), dtype=jnp.float32)

    a_idx, p_idx, n_idx = _npair_sampling(labels)                   # N=16, M=30

    # block_n=8 -> tn=8, 2 grid steps: exercises the parallel per-tile partials.
    loss = angular_loss_pallas(batch, jnp.asarray(labels),
                               jnp.asarray(a_idx), jnp.asarray(p_idx),
                               alpha_deg=45.0, lam=2.0, l2_weight=0.005,
                               block_n=8)
    loss = jax.block_until_ready(loss)

    ref = angular_loss_ref(batch[a_idx], batch[p_idx], batch[n_idx], batch,
                           alpha_deg=45.0, lam=2.0, l2_weight=0.005)
    # bf16 MXU operands (f32 exp/log/accumulation) -> bf16-appropriate tolerance.
    assert np.allclose(np.asarray(loss), np.asarray(ref), rtol=2e-2, atol=2e-2), (loss, ref)
    print("KERNEL_OK")
</pallas_src>

<mosaic_0001>
module attributes {stable_mosaic.version = 11 : i64} {
  func.func @_angular_kernel(%arg0: i32, %arg1: memref<8x1xi32, #tpu.memory_space<vmem>>, %arg2: memref<1x128xi32, #tpu.memory_space<vmem>>, %arg3: memref<8x128xf32, #tpu.memory_space<vmem>>, %arg4: memref<8x128xf32, #tpu.memory_space<vmem>>, %arg5: memref<128x128xbf16, #tpu.memory_space<vmem>>, %arg6: memref<1x128xf32, #tpu.memory_space<vmem>>, %arg7: memref<8x128xf32, #tpu.memory_space<vmem>>) attributes {dimension_semantics = [#tpu.dimension_semantics<parallel>], iteration_bounds = array<i64: 2>, scalar_prefetch = 0 : i64, scratch_operands = 0 : i64, tpu.core_type = #tpu.core_type<tc>, window_params = [{transform_indices = @transform_0, window_bounds = array<i64: 8, 1>}, {pipeline_mode = #tpu.pipeline_mode<synchronous>, transform_indices = @transform_1, window_bounds = array<i64: 1, 128>}, {transform_indices = @transform_2, window_bounds = array<i64: 8, 128>}, {transform_indices = @transform_3, window_bounds = array<i64: 8, 128>}, {pipeline_mode = #tpu.pipeline_mode<synchronous>, transform_indices = @transform_4, window_bounds = array<i64: 128, 128>}, {pipeline_mode = #tpu.pipeline_mode<synchronous>, transform_indices = @transform_5, window_bounds = array<i64: 1, 128>}, {transform_indices = @transform_6, window_bounds = array<i64: 8, 128>}]} {
    %c0 = arith.constant 0 : index
    %c0_0 = arith.constant 0 : index
    %0 = vector.load %arg3[%c0, %c0_0] : memref<8x128xf32, #tpu.memory_space<vmem>>, vector<8x128xf32>
    %c0_1 = arith.constant 0 : index
    %c0_2 = arith.constant 0 : index
    %1 = vector.load %arg4[%c0_1, %c0_2] : memref<8x128xf32, #tpu.memory_space<vmem>>, vector<8x128xf32>
    %c0_3 = arith.constant 0 : index
    %c0_4 = arith.constant 0 : index
    %2 = vector.load %arg1[%c0_3, %c0_4] : memref<8x1xi32, #tpu.memory_space<vmem>>, vector<8x1xi32>
    %c0_5 = arith.constant 0 : index
    %c0_6 = arith.constant 0 : index
    %3 = vector.load %arg2[%c0_5, %c0_6] : memref<1x128xi32, #tpu.memory_space<vmem>>, vector<1x128xi32>
    %c0_7 = arith.constant 0 : index
    %c0_8 = arith.constant 0 : index
    %4 = vector.load %arg5[%c0_7, %c0_8] : memref<128x128xbf16, #tpu.memory_space<vmem>>, vector<128x128xbf16>
    %c0_9 = arith.constant 0 : index
    %c0_10 = arith.constant 0 : index
    %5 = vector.load %arg6[%c0_9, %c0_10] : memref<1x128xf32, #tpu.memory_space<vmem>>, vector<1x128xf32>
    %6 = arith.mulf %0, %0 : vector<8x128xf32>
    %cst = arith.constant dense<0.000000e+00> : vector<8xf32>
    %7 = vector.multi_reduction <add>, %6, %cst [1] : vector<8x128xf32> to vector<8xf32>
    %8 = vector.shape_cast %7 : vector<8xf32> to vector<8x1xf32>
    %cst_11 = arith.constant 1.000000e-24 : f32
    %9 = vector.broadcast %cst_11 : f32 to vector<8x1xf32>
    %10 = arith.maximumf %8, %9 : vector<8x1xf32>
    %11 = math.rsqrt %10 : vector<8x1xf32>
    %12 = arith.mulf %1, %1 : vector<8x128xf32>
    %cst_12 = arith.constant dense<0.000000e+00> : vector<8xf32>
    %13 = vector.multi_reduction <add>, %12, %cst_12 [1] : vector<8x128xf32> to vector<8xf32>
    %14 = vector.shape_cast %13 : vector<8xf32> to vector<8x1xf32>
    %cst_13 = arith.constant 1.000000e-24 : f32
    %15 = vector.broadcast %cst_13 : f32 to vector<8x1xf32>
    %16 = arith.maximumf %14, %15 : vector<8x1xf32>
    %17 = math.rsqrt %16 : vector<8x1xf32>
    %18 = vector.broadcast %11 : vector<8x1xf32> to vector<8x128xf32>
    %19 = arith.mulf %0, %18 : vector<8x128xf32>
    %20 = vector.broadcast %17 : vector<8x1xf32> to vector<8x128xf32>
    %21 = arith.mulf %1, %20 : vector<8x128xf32>
    %22 = vector.broadcast %2 : vector<8x1xi32> to vector<8x128xi32>
    %23 = vector.broadcast %3 : vector<1x128xi32> to vector<8x128xi32>
    %24 = arith.cmpi ne, %22, %23 : vector<8x128xi32>
    %c0_i32 = arith.constant 0 : i32
    %25 = vector.broadcast %c0_i32 : i32 to vector<8x1xi32>
    %26 = arith.cmpi sge, %2, %25 : vector<8x1xi32>
    %27 = vector.broadcast %26 : vector<8x1xi1> to vector<8x128xi1>
    %28 = arith.andi %24, %27 : vector<8x128xi1>
    %c0_i32_14 = arith.constant 0 : i32
    %29 = vector.broadcast %c0_i32_14 : i32 to vector<1x128xi32>
    %30 = arith.cmpi sge, %3, %29 : vector<1x128xi32>
    %31 = vector.broadcast %30 : vector<1x128xi1> to vector<8x128xi1>
    %32 = arith.andi %28, %31 : vector<8x128xi1>
    %cst_15 = arith.constant 1.000000e+00 : f32
    %cst_16 = arith.constant 0.000000e+00 : f32
    %33 = vector.broadcast %cst_15 : f32 to vector<8x128xf32>
    %34 = vector.broadcast %cst_16 : f32 to vector<8x128xf32>
    %35 = arith.select %32, %33, %34 : vector<8x128xi1>, vector<8x128xf32>
    %36 = arith.addf %19, %21 : vector<8x128xf32>
    %37 = tpu.concatenate %0, %36 in 0 : vector<8x128xf32>, vector<8x128xf32> -> vector<16x128xf32>
    %38 = arith.truncf %37 : vector<16x128xf32> to vector<16x128xbf16>
    %cst_17 = arith.constant dense<0.000000e+00> : vector<16x128xf32>
    %39 = tpu.matmul %38, %4, %cst_17 {dimension_numbers = #tpu.dot_dimension_numbers<[1], [1], [0], [0], [0, 0, 1, 0], [], []>} : vector<16x128xbf16>, vector<128x128xbf16>, vector<16x128xf32> -> vector<16x128xf32>
    %40 = vector.extract_strided_slice %39 {offsets = [0, 0], sizes = [8, 128], strides = [1, 1]} : vector<16x128xf32> to vector<8x128xf32>
    %41 = vector.extract_strided_slice %39 {offsets = [8, 0], sizes = [8, 128], strides = [1, 1]} : vector<16x128xf32> to vector<8x128xf32>
    %42 = vector.broadcast %5 : vector<1x128xf32> to vector<8x128xf32>
    %43 = arith.mulf %41, %42 : vector<8x128xf32>
    %44 = arith.mulf %19, %21 : vector<8x128xf32>
    %cst_18 = arith.constant dense<0.000000e+00> : vector<8xf32>
    %45 = vector.multi_reduction <add>, %44, %cst_18 [1] : vector<8x128xf32> to vector<8xf32>
    %46 = vector.shape_cast %45 : vector<8xf32> to vector<8x1xf32>
    %cst_19 = arith.constant 4.000000e+00 : f32
    %47 = vector.broadcast %cst_19 : f32 to vector<8x1xf32>
    %48 = arith.mulf %47, %46 : vector<8x1xf32>
    %cst_20 = arith.constant 4.000000e+00 : f32
    %49 = vector.broadcast %cst_20 : f32 to vector<8x128xf32>
    %50 = arith.mulf %49, %43 : vector<8x128xf32>
    %51 = vector.broadcast %48 : vector<8x1xf32> to vector<8x128xf32>
    %52 = arith.subf %50, %51 : vector<8x128xf32>
    %53 = math.exp %52 : vector<8x128xf32>
    %54 = arith.mulf %53, %35 : vector<8x128xf32>
    %cst_21 = arith.constant dense<0.000000e+00> : vector<8xf32>
    %55 = vector.multi_reduction <add>, %54, %cst_21 [1] : vector<8x128xf32> to vector<8xf32>
    %56 = vector.shape_cast %55 : vector<8xf32> to vector<8x1xf32>
    %cst_22 = arith.constant 1.000000e+00 : f32
    %57 = vector.broadcast %cst_22 : f32 to vector<8x1xf32>
    %58 = arith.addf %56, %57 : vector<8x1xf32>
    %59 = math.log %58 : vector<8x1xf32>
    %60 = arith.mulf %0, %1 : vector<8x128xf32>
    %cst_23 = arith.constant dense<0.000000e+00> : vector<8xf32>
    %61 = vector.multi_reduction <add>, %60, %cst_23 [1] : vector<8x128xf32> to vector<8xf32>
    %62 = vector.shape_cast %61 : vector<8xf32> to vector<8x1xf32>
    %63 = vector.broadcast %62 : vector<8x1xf32> to vector<8x128xf32>
    %64 = arith.subf %40, %63 : vector<8x128xf32>
    %cst_24 = arith.constant -5.000000e+01 : f32
    %cst_25 = arith.constant 5.000000e+01 : f32
    %65 = vector.broadcast %cst_24 : f32 to vector<8x128xf32>
    %66 = arith.maximumf %65, %64 : vector<8x128xf32>
    %67 = vector.broadcast %cst_25 : f32 to vector<8x128xf32>
    %68 = arith.minimumf %67, %66 : vector<8x128xf32>
    %69 = math.exp %68 : vector<8x128xf32>
    %70 = arith.mulf %69, %35 : vector<8x128xf32>
    %cst_26 = arith.constant dense<0.000000e+00> : vector<8xf32>
    %71 = vector.multi_reduction <add>, %70, %cst_26 [1] : vector<8x128xf32> to vector<8xf32>
    %72 = vector.shape_cast %71 : vector<8xf32> to vector<8x1xf32>
    %cst_27 = arith.constant 1.000000e+00 : f32
    %73 = vector.broadcast %cst_27 : f32 to vector<8x1xf32>
    %74 = arith.addf %72, %73 : vector<8x1xf32>
    %75 = math.log %74 : vector<8x1xf32>
    %cst_28 = arith.constant 2.000000e+00 : f32
    %76 = vector.broadcast %cst_28 : f32 to vector<8x1xf32>
    %77 = arith.mulf %76, %59 : vector<8x1xf32>
    %78 = arith.addf %75, %77 : vector<8x1xf32>
    %79 = vector.shape_cast %78 : vector<8x1xf32> to vector<1x8x1xf32>
    %cst_29 = arith.constant dense<0.000000e+00> : vector<1xf32>
    %80 = vector.multi_reduction <add>, %79, %cst_29 [1, 2] : vector<1x8x1xf32> to vector<1xf32>
    %81 = vector.shape_cast %80 : vector<1xf32> to vector<1x1x1xf32>
    %82 = vector.extract %81[0, 0, 0] : f32 from vector<1x1x1xf32>
    %83 = vector.broadcast %82 : f32 to vector<1x1xf32>
    %84 = vector.shape_cast %83 : vector<1x1xf32> to vector<1x1xf32>
    %85 = vector.broadcast %84 : vector<1x1xf32> to vector<8x128xf32>
    %c0_30 = arith.constant 0 : index
    %c0_31 = arith.constant 0 : index
    %86 = vector.load %arg7[%c0_30, %c0_31] : memref<8x128xf32, #tpu.memory_space<vmem>>, vector<8x128xf32>
    tpu.vector_store %arg7[%c0_30, %c0_31], %85 {strides = array<i32>} : memref<8x128xf32, #tpu.memory_space<vmem>>, vector<8x128xf32>,
    return
  }
  func.func @transform_0(%arg0: i32) -> (i32, i32) {
    %c0_i32 = arith.constant 0 : i32
    %c0_i32_0 = arith.constant 0 : i32
    return %arg0, %c0_i32 : i32, i32
  }
  func.func @transform_1(%arg0: i32) -> (i32, i32) {
    %c0_i32 = arith.constant 0 : i32
    %c0_i32_0 = arith.constant 0 : i32
    %c0_i32_1 = arith.constant 0 : i32
    return %c0_i32, %c0_i32_0 : i32, i32
  }
  func.func @transform_2(%arg0: i32) -> (i32, i32) {
    %c0_i32 = arith.constant 0 : i32
    %c0_i32_0 = arith.constant 0 : i32
    return %arg0, %c0_i32 : i32, i32
  }
  func.func @transform_3(%arg0: i32) -> (i32, i32) {
    %c0_i32 = arith.constant 0 : i32
    %c0_i32_0 = arith.constant 0 : i32
    return %arg0, %c0_i32 : i32, i32
  }
  func.func @transform_4(%arg0: i32) -> (i32, i32) {
    %c0_i32 = arith.constant 0 : i32
    %c0_i32_0 = arith.constant 0 : i32
    %c0_i32_1 = arith.constant 0 : i32
    return %c0_i32, %c0_i32_0 : i32, i32
  }
  func.func @transform_5(%arg0: i32) -> (i32, i32) {
    %c0_i32 = arith.constant 0 : i32
    %c0_i32_0 = arith.constant 0 : i32
    %c0_i32_1 = arith.constant 0 : i32
    return %c0_i32, %c0_i32_0 : i32, i32
  }
  func.func @transform_6(%arg0: i32) -> (i32, i32) {
    %c0_i32 = arith.constant 0 : i32
    %c0_i32_0 = arith.constant 0 : i32
    return %arg0, %c0_i32 : i32, i32
  }
}

module attributes {stable_mosaic.version = 11 : i64} {
  func.func @_angular_kernel(%arg0: i32, %arg1: memref<8x1xi32, #tpu.memory_space<vmem>>, %arg2: memref<1x128xi32, #tpu.memory_space<vmem>>, %arg3: memref<8x128xf32, #tpu.memory_space<vmem>>, %arg4: memref<8x128xf32, #tpu.memory_space<vmem>>, %arg5: memref<128x128xbf16, #tpu.memory_space<vmem>>, %arg6: memref<1x128xf32, #tpu.memory_space<vmem>>, %arg7: memref<8x128xf32, #tpu.memory_space<vmem>>) attributes {dimension_semantics = [#tpu.dimension_semantics<parallel>], iteration_bounds = array<i64: 2>, scalar_prefetch = 0 : i64, scratch_operands = 0 : i64, tpu.core_type = #tpu.core_type<tc>, window_params = [{transform_indices = @transform_0, window_bounds = array<i64: 8, 1>}, {pipeline_mode = #tpu.pipeline_mode<synchronous>, transform_indices = @transform_1, window_bounds = array<i64: 1, 128>}, {transform_indices = @transform_2, window_bounds = array<i64: 8, 128>}, {transform_indices = @transform_3, window_bounds = array<i64: 8, 128>}, {pipeline_mode = #tpu.pipeline_mode<synchronous>, transform_indices = @transform_4, window_bounds = array<i64: 128, 128>}, {pipeline_mode = #tpu.pipeline_mode<synchronous>, transform_indices = @transform_5, window_bounds = array<i64: 1, 128>}, {transform_indices = @transform_6, window_bounds = array<i64: 8, 128>}]} {
    %c0 = arith.constant 0 : index
    %c0_0 = arith.constant 0 : index
    %0 = vector.load %arg3[%c0, %c0_0] : memref<8x128xf32, #tpu.memory_space<vmem>>, vector<8x128xf32>
    %c0_1 = arith.constant 0 : index
    %c0_2 = arith.constant 0 : index
    %1 = vector.load %arg4[%c0_1, %c0_2] : memref<8x128xf32, #tpu.memory_space<vmem>>, vector<8x128xf32>
    %c0_3 = arith.constant 0 : index
    %c0_4 = arith.constant 0 : index
    %2 = vector.load %arg1[%c0_3, %c0_4] : memref<8x1xi32, #tpu.memory_space<vmem>>, vector<8x1xi32>
    %c0_5 = arith.constant 0 : index
    %c0_6 = arith.constant 0 : index
    %3 = vector.load %arg2[%c0_5, %c0_6] : memref<1x128xi32, #tpu.memory_space<vmem>>, vector<1x128xi32>
    %c0_7 = arith.constant 0 : index
    %c0_8 = arith.constant 0 : index
    %4 = vector.load %arg5[%c0_7, %c0_8] : memref<128x128xbf16, #tpu.memory_space<vmem>>, vector<128x128xbf16>
    %c0_9 = arith.constant 0 : index
    %c0_10 = arith.constant 0 : index
    %5 = vector.load %arg6[%c0_9, %c0_10] : memref<1x128xf32, #tpu.memory_space<vmem>>, vector<1x128xf32>
    %6 = arith.mulf %0, %0 : vector<8x128xf32>
    %cst = arith.constant dense<0.000000e+00> : vector<8xf32>
    %7 = vector.multi_reduction <add>, %6, %cst [1] : vector<8x128xf32> to vector<8xf32>
    %8 = vector.shape_cast %7 : vector<8xf32> to vector<8x1xf32>
    %cst_11 = arith.constant 1.000000e-24 : f32
    %9 = vector.broadcast %cst_11 : f32 to vector<8x1xf32>
    %10 = arith.maximumf %8, %9 : vector<8x1xf32>
    %11 = math.rsqrt %10 : vector<8x1xf32>
    %12 = arith.mulf %1, %1 : vector<8x128xf32>
    %cst_12 = arith.constant dense<0.000000e+00> : vector<8xf32>
    %13 = vector.multi_reduction <add>, %12, %cst_12 [1] : vector<8x128xf32> to vector<8xf32>
    %14 = vector.shape_cast %13 : vector<8xf32> to vector<8x1xf32>
    %cst_13 = arith.constant 1.000000e-24 : f32
    %15 = vector.broadcast %cst_13 : f32 to vector<8x1xf32>
    %16 = arith.maximumf %14, %15 : vector<8x1xf32>
    %17 = math.rsqrt %16 : vector<8x1xf32>
    %18 = vector.broadcast %11 : vector<8x1xf32> to vector<8x128xf32>
    %19 = arith.mulf %0, %18 : vector<8x128xf32>
    %20 = vector.broadcast %17 : vector<8x1xf32> to vector<8x128xf32>
    %21 = arith.mulf %1, %20 : vector<8x128xf32>
    %22 = vector.broadcast %2 : vector<8x1xi32> to vector<8x128xi32>
    %23 = vector.broadcast %3 : vector<1x128xi32> to vector<8x128xi32>
    %24 = arith.cmpi ne, %22, %23 : vector<8x128xi32>
    %c0_i32 = arith.constant 0 : i32
    %25 = vector.broadcast %c0_i32 : i32 to vector<8x1xi32>
    %26 = arith.cmpi sge, %2, %25 : vector<8x1xi32>
    %27 = vector.broadcast %26 : vector<8x1xi1> to vector<8x128xi1>
    %28 = arith.andi %24, %27 : vector<8x128xi1>
    %c0_i32_14 = arith.constant 0 : i32
    %29 = vector.broadcast %c0_i32_14 : i32 to vector<1x128xi32>
    %30 = arith.cmpi sge, %3, %29 : vector<1x128xi32>
    %31 = vector.broadcast %30 : vector<1x128xi1> to vector<8x128xi1>
    %32 = arith.andi %28, %31 : vector<8x128xi1>
    %cst_15 = arith.constant 1.000000e+00 : f32
    %cst_16 = arith.constant 0.000000e+00 : f32
    %33 = vector.broadcast %cst_15 : f32 to vector<8x128xf32>
    %34 = vector.broadcast %cst_16 : f32 to vector<8x128xf32>
    %35 = arith.select %32, %33, %34 : vector<8x128xi1>, vector<8x128xf32>
    %36 = arith.addf %19, %21 : vector<8x128xf32>
    %37 = tpu.concatenate %0, %36 in 0 : vector<8x128xf32>, vector<8x128xf32> -> vector<16x128xf32>
    %38 = arith.truncf %37 : vector<16x128xf32> to vector<16x128xbf16>
    %cst_17 = arith.constant dense<0.000000e+00> : vector<16x128xf32>
    %39 = tpu.matmul %38, %4, %cst_17 {dimension_numbers = #tpu.dot_dimension_numbers<[1], [1], [0], [0], [0, 0, 1, 0], [], []>} : vector<16x128xbf16>, vector<128x128xbf16>, vector<16x128xf32> -> vector<16x128xf32>
    %40 = vector.extract_strided_slice %39 {offsets = [0, 0], sizes = [8, 128], strides = [1, 1]} : vector<16x128xf32> to vector<8x128xf32>
    %41 = vector.extract_strided_slice %39 {offsets = [8, 0], sizes = [8, 128], strides = [1, 1]} : vector<16x128xf32> to vector<8x128xf32>
    %42 = vector.broadcast %5 : vector<1x128xf32> to vector<8x128xf32>
    %43 = arith.mulf %41, %42 : vector<8x128xf32>
    %44 = arith.mulf %19, %21 : vector<8x128xf32>
    %cst_18 = arith.constant dense<0.000000e+00> : vector<8xf32>
    %45 = vector.multi_reduction <add>, %44, %cst_18 [1] : vector<8x128xf32> to vector<8xf32>
    %46 = vector.shape_cast %45 : vector<8xf32> to vector<8x1xf32>
    %cst_19 = arith.constant 4.000000e+00 : f32
    %47 = vector.broadcast %cst_19 : f32 to vector<8x1xf32>
    %48 = arith.mulf %47, %46 : vector<8x1xf32>
    %cst_20 = arith.constant 4.000000e+00 : f32
    %49 = vector.broadcast %cst_20 : f32 to vector<8x128xf32>
    %50 = arith.mulf %49, %43 : vector<8x128xf32>
    %51 = vector.broadcast %48 : vector<8x1xf32> to vector<8x128xf32>
    %52 = arith.subf %50, %51 : vector<8x128xf32>
    %53 = math.exp %52 : vector<8x128xf32>
    %54 = arith.mulf %53, %35 : vector<8x128xf32>
    %cst_21 = arith.constant dense<0.000000e+00> : vector<8xf32>
    %55 = vector.multi_reduction <add>, %54, %cst_21 [1] : vector<8x128xf32> to vector<8xf32>
    %56 = vector.shape_cast %55 : vector<8xf32> to vector<8x1xf32>
    %cst_22 = arith.constant 1.000000e+00 : f32
    %57 = vector.broadcast %cst_22 : f32 to vector<8x1xf32>
    %58 = arith.addf %56, %57 : vector<8x1xf32>
    %59 = math.log %58 : vector<8x1xf32>
    %60 = arith.mulf %0, %1 : vector<8x128xf32>
    %cst_23 = arith.constant dense<0.000000e+00> : vector<8xf32>
    %61 = vector.multi_reduction <add>, %60, %cst_23 [1] : vector<8x128xf32> to vector<8xf32>
    %62 = vector.shape_cast %61 : vector<8xf32> to vector<8x1xf32>
    %63 = vector.broadcast %62 : vector<8x1xf32> to vector<8x128xf32>
    %64 = arith.subf %40, %63 : vector<8x128xf32>
    %cst_24 = arith.constant -5.000000e+01 : f32
    %cst_25 = arith.constant 5.000000e+01 : f32
    %65 = vector.broadcast %cst_24 : f32 to vector<8x128xf32>
    %66 = arith.maximumf %65, %64 : vector<8x128xf32>
    %67 = vector.broadcast %cst_25 : f32 to vector<8x128xf32>
    %68 = arith.minimumf %67, %66 : vector<8x128xf32>
    %69 = math.exp %68 : vector<8x128xf32>
    %70 = arith.mulf %69, %35 : vector<8x128xf32>
    %cst_26 = arith.constant dense<0.000000e+00> : vector<8xf32>
    %71 = vector.multi_reduction <add>, %70, %cst_26 [1] : vector<8x128xf32> to vector<8xf32>
    %72 = vector.shape_cast %71 : vector<8xf32> to vector<8x1xf32>
    %cst_27 = arith.constant 1.000000e+00 : f32
    %73 = vector.broadcast %cst_27 : f32 to vector<8x1xf32>
    %74 = arith.addf %72, %73 : vector<8x1xf32>
    %75 = math.log %74 : vector<8x1xf32>
    %cst_28 = arith.constant 2.000000e+00 : f32
    %76 = vector.broadcast %cst_28 : f32 to vector<8x1xf32>
    %77 = arith.mulf %76, %59 : vector<8x1xf32>
    %78 = arith.addf %75, %77 : vector<8x1xf32>
    %79 = vector.shape_cast %78 : vector<8x1xf32> to vector<1x8x1xf32>
    %cst_29 = arith.constant dense<0.000000e+00> : vector<1xf32>
    %80 = vector.multi_reduction <add>, %79, %cst_29 [1, 2] : vector<1x8x1xf32> to vector<1xf32>
    %81 = vector.shape_cast %80 : vector<1xf32> to vector<1x1x1xf32>
    %82 = vector.extract %81[0, 0, 0] : f32 from vector<1x1x1xf32>
    %83 = vector.broadcast %82 : f32 to vector<1x1xf32>
    %84 = vector.shape_cast %83 : vector<1x1xf32> to vector<1x1xf32>
    %85 = vector.broadcast %84 : vector<1x1xf32> to vector<8x128xf32>
    %c0_30 = arith.constant 0 : index
    %c0_31 = arith.constant 0 : index
    %86 = vector.load %arg7[%c0_30, %c0_31] : memref<8x128xf32, #tpu.memory_space<vmem>>, vector<8x128xf32>
    tpu.vector_store %arg7[%c0_30, %c0_31], %85 {strides = array<i32>} : memref<8x128xf32, #tpu.memory_space<vmem>>, vector<8x128xf32>,
    return
  }
  func.func @transform_0(%arg0: i32) -> (i32, i32) {
    %c0_i32 = arith.constant 0 : i32
    %c0_i32_0 = arith.constant 0 : i32
    return %arg0, %c0_i32 : i32, i32
  }
  func.func @transform_1(%arg0: i32) -> (i32, i32) {
    %c0_i32 = arith.constant 0 : i32
    %c0_i32_0 = arith.constant 0 : i32
    %c0_i32_1 = arith.constant 0 : i32
    return %c0_i32, %c0_i32_0 : i32, i32
  }
  func.func @transform_2(%arg0: i32) -> (i32, i32) {
    %c0_i32 = arith.constant 0 : i32
    %c0_i32_0 = arith.constant 0 : i32
    return %arg0, %c0_i32 : i32, i32
  }
  func.func @transform_3(%arg0: i32) -> (i32, i32) {
    %c0_i32 = arith.constant 0 : i32
    %c0_i32_0 = arith.constant 0 : i32
    return %arg0, %c0_i32 : i32, i32
  }
  func.func @transform_4(%arg0: i32) -> (i32, i32) {
    %c0_i32 = arith.constant 0 : i32
    %c0_i32_0 = arith.constant 0 : i32
    %c0_i32_1 = arith.constant 0 : i32
    return %c0_i32, %c0_i32_0 : i32, i32
  }
  func.func @transform_5(%arg0: i32) -> (i32, i32) {
    %c0_i32 = arith.constant 0 : i32
    %c0_i32_0 = arith.constant 0 : i32
    %c0_i32_1 = arith.constant 0 : i32
    return %c0_i32, %c0_i32_0 : i32, i32
  }
  func.func @transform_6(%arg0: i32) -> (i32, i32) {
    %c0_i32 = arith.constant 0 : i32
    %c0_i32_0 = arith.constant 0 : i32
    return %arg0, %c0_i32 : i32, i32
  }
}

</mosaic_0001>

<bundles_post_ra>
// kernel: tpu_custom_call.1
= control target key start
LH: loop header
LB: loop body
LE: loop exit
PB: predicated region body
PF: predicated region fallthrough
CT: control target
= control target key end

     0   :  { %11 = vsyncpa [#allocation3], 0  ;;  %s1174_s0 = inlined_call_operand.vmem [shape: s32[16,1], index: 0, kind: input, shape index: {}]   ;;  %s1175_s1 = inlined_call_operand.vmem [shape: s32[1,128], index: 1, kind: input, shape index: {}]   ;;  %s1176_s2 = inlined_call_operand.vmem [shape: f32[16,128], index: 2, kind: input, shape index: {}]   ;;  %s1177_s3 = inlined_call_operand.hbm [shape: f32[16,128], index: 3, kind: input, shape index: {}]   ;;  %s1178_s4 = inlined_call_operand.hbm [shape: bf16[128,128], index: 4, kind: input, shape index: {}]   ;;  %s1179_s5 = inlined_call_operand.vmem [shape: f32[1,128], index: 5, kind: input, shape index: {}]   ;;  %s1180_s6 = inlined_call_operand.hbm [shape: f32[16,128], index: 6, kind: output, shape index: {}]  }
   0x1   :  { %13 = vsyncpa [#allocation3 + $0x1], 0 }
   0x2   :  { %14 = vsyncpa [#allocation6], 0 }
   0x3   :  { %15 = vsyncpa [#allocation4], 0 }
   0x4   :  { %17 = vsyncpa [#allocation4 + $0x1], 0  ;;  %s947_s21 = smov 0   ;;  %s949_s22 = smov 0  }
   0x5   :  { %s951_s23 = smov 0   ;;  %s953_s24 = smov 0  }
   0x6 LB: > { %s968_s25 = sadd.s32 4294967295, %s902_s24   ;;  %s633_s26 = sadd.s32 4294967294, %s902_s24   ;;  %s902_s24 = sphi %s953_s24, %s1200_s24   ;;  %s898_s23 = sphi %s951_s23, %s1199_s23   ;;  %s894_s22 = sphi %s949_s22, %s1198_s22   ;;  %s890_s21 = sphi %s947_s21, %s1197_s21  }
   0x7   : > { %p116_p0 = scmp.ne.s32.totalorder %s894_s22, %s890_s21  ;;  %p1181_p1 = scmp.eq.s32.totalorder %s968_s25, 0 }
   0x8   : > { %p188_p3 = scmp.eq.s32.totalorder %s633_s26, 1  ;;  %p634_p5 = scmp.ge.s32.totalorder %s902_s24, 1 }
   0x9   : > { %p977_p4 = por %p1181_p1, %p116_p0  ;;  %p195_p7 = scmp.lt.s32.totalorder %s902_s24, 3 }
   0xa   : > { %p982_p6 = por %p188_p3, %p116_p0  ;;  %s904_s30 = smov [#allocation5]  }
   0xb   : > { %s1184_s27 = scalar_select %p977_p4, 1, 0 }
   0xc   : > { %s1185_s28 = scalar_select %p982_p6, 1, 0 }
   0xd   : > { %p987_p8 = pnand %p634_p5, %p195_p7  ;;  %s210_s7 = sshll.u32 %s904_s30, 4  ;;  %s991_s7 = int_to_ptr.vmem [resolvable:$true] %s210_s7 }
   0xe   : > { %s1003_s9 = sadd.s32 1, %s902_s24   ;;  %s103_s10 = sadd.s32 1, %s898_s23 }
   0xf   : > { %s1186_s29 = scalar_select %p987_p8, 1, 0 }
  0x10   : > { %p698_p9 = pneg %p987_p8  ;;  %s100_s11 = ssub.s32 %s902_s24, %s1003_s9 }
  0x11   : > { %s774_s14 = scalar_lea.hbm %s1178_s4, 1024 }
  0x12   : > { %p998_p11 = pnand %p698_p9, %p1181_p1  ;;  %p775_p12 = scmp.ne.s32.totalorder %s1178_s4, %s774_s14 }
  0x13   : > { %p781_p5 = scmp.lt.u32.totalorder %s774_s14, %s1178_s4 }
  0x14   : > { %p776_p13 = pneg %p998_p11 }
  0x16   : > { %p777_p0 = pnand %p776_p13, %p775_p12 }
  0x18   : > { %p778_p3 = pneg %p777_p0 }
  0x1a   : > { %p783_p7 = pnand %p781_p5, %p778_p3 }
  0x1c   : > { %786 = shalt.err (!%p783_p7)
}
  0x1d   : > { %s787_s19 = scalar_lea.vmem %s991_s7, 1024  ;;  %p795_p2 = scmp.lt.s32.totalorder %s991_s7, %s991_s7 }
  0x1e   : > { %p788_p9 = scmp.ne.s32.totalorder %s991_s7, %s787_s19  ;;  %p796_p6 = scmp.lt.s32.totalorder %s787_s19, %s787_s19 }
  0x20   : > { %p790_p10 = pnand %p788_p9, %p776_p13  ;;  %p797_p4 = por %p796_p6, %p795_p2 }
  0x22   : > { %p791_p1 = pneg %p790_p10 }
  0x24   : > { %p798_p8 = pnand %p797_p4, %p791_p1 }
  0x26   : > { %801 = shalt.err (!%p798_p8)
}
  0x27   : > { %s905_s20 = smov 64   ;;  %s906_s26 = smov 4  }
  0x28   : > { %701 = dma.hbm_to_vmem [thread:$0]  (!%p998_p11), %s1178_s4, 1024, %s991_s7, [#allocation6], %s905_s20, %s905_s20, %s906_s26  }
  0x29   : > { %p101_p2 = scmp.eq.s32.totalorder %s100_s11, 0  ;;  %p110_p1 = scmp.ne.s32.totalorder %s898_s23, %s894_s22 }
  0x2a   : > { %p111_p4 = scmp.eq.s32.totalorder %s902_s24, 0  ;;  %p711_p6 = scmp.lt.s32.totalorder %s902_s24, 2 }
  0x2b   : > { %s1034_s13 = scalar_select %p101_p2, %s898_s23, %s103_s10  }
  0x2c   : > { %p112_p8 = por %p111_p4, %p110_p1  ;;  %p1188_p10 = scmp.eq.s32.totalorder %s968_s25, 1 }
  0x2d   : > { %s241_s15 = sand.u32 1, %s898_s23   ;;  %s638_s16 = sshll.u32 %s902_s24, 7 }
  0x2e   : > { %p1038_p12 = por %p1188_p10, %p110_p1  ;;  %s637_s17 = sshll.u32 %s241_s15, 3 }
  0x2f   : > { %s1047_s19 = scalar_lea.hbm %s1177_s3, %s638_s16  ;;  %s245_s7 = scalar_lea.vmem [#allocation2], %s637_s17 }
  0x30   : > { %s252_s10 = sshll.u32 %s245_s7, 4  ;;  %p1049_p11 = pnand %p711_p6, %p112_p8  ;;  %s1053_s10 = int_to_ptr.vmem [resolvable:$true] %s252_s10 }
  0x31   : > { %s242_s20 = scalar_lea.sflag [#allocation3], %s241_s15  ;;  %s802_s26 = scalar_lea.hbm %s1047_s19, 128 }
  0x32   : > { %p803_p13 = scmp.ne.s32.totalorder %s1047_s19, %s802_s26  ;;  %p804_p0 = pneg %p1049_p11 }
  0x33   : > { %s807_s16 = scalar_lea.hbm %s1177_s3, 256  ;;  %p808_p7 = scmp.lt.u32.totalorder %s1047_s19, %s1177_s3 }
  0x34   : > { %p805_p3 = pnand %p804_p0, %p803_p13  ;;  %p809_p9 = scmp.lt.u32.totalorder %s807_s16, %s802_s26 }
  0x35   : > { %p811_p1 = scmp.lt.u32.totalorder %s802_s26, %s1047_s19 }
  0x36   : > { %p806_p5 = pneg %p805_p3  ;;  %p810_p2 = por %p809_p9, %p808_p7 }
  0x38   : > { %p812_p4 = por %p811_p1, %p810_p2 }
  0x3a   : > { %p813_p6 = pnand %p812_p4, %p806_p5 }
  0x3c   : > { %816 = shalt.err (!%p813_p6)
}
  0x3d   : > { %s817_s15 = scalar_lea.vmem %s1053_s10, 128  ;;  %s907_s18 = smov [#allocation2]  }
  0x3e   : > { %p818_p8 = scmp.ne.s32.totalorder %s1053_s10, %s817_s15  ;;  %s822_s7 = sshll.u32 %s907_s18, 4  ;;  %s823_s7 = int_to_ptr.vmem [resolvable:$false] %s822_s7 }
  0x3f   : > { %s824_s30 = scalar_lea.vmem %s823_s7, 256  ;;  %p825_p3 = scmp.lt.s32.totalorder %s1053_s10, %s823_s7 }
  0x40   : > { %p820_p10 = pnand %p818_p8, %p804_p0  ;;  %p826_p7 = scmp.lt.s32.totalorder %s824_s30, %s817_s15 }
  0x42   : > { %p821_p13 = pneg %p820_p10  ;;  %p827_p9 = por %p826_p7, %p825_p3 }
  0x44   : > { %p828_p2 = pnand %p827_p9, %p821_p13 }
  0x46   : > { %831 = shalt.err (!%p828_p2)
}
  0x47   : > { %705 = dma.hbm_to_vmem [thread:$0]  (!%p1049_p11), %s1047_s19, 128, %s1053_s10, %s242_s20  }
  0x48   : > { %p1191_p5 = scmp.ne.s32.totalorder %s1186_s29, 0 }
  0x49   : > { %s1083_s26 = sand.u32 (!%p1191_p5), 1, %s894_s22   ;;  %p1192_p0 = scmp.ne.s32.totalorder (!%p1191_p5), %s1184_s27, 0 }
  0x4a   : > { %261 = sbr.rel (%p1191_p5) target bundleno = 875 (0x36b), region = 44  ;;  %s640_s12 = sshll.u32 (!%p1191_p5), %s1083_s26, 3 }
  0x4b   : > { %s264_s16 = scalar_lea.sflag (!%p1191_p5), [#allocation3], %s1083_s26  ;;  %s267_s17 = scalar_lea.vmem (!%p1191_p5), [#allocation2], %s640_s12 }
  0x51   : > { %877 = dma.done.wait (%p1192_p0), %s264_s16, 128  }
  0x52   : > { %879 = vsyncadd (%p1192_p0), %s264_s16, 4294967168  ;;  %p1193_p11 = scmp.eq.s32.totalorder %s968_s25, 0 }
  0x54   : > { %881 = dma.done.wait (%p1193_p11), [#allocation6], 1024   ;;  %p1194_p1 = pmov %p1193_p11 }
  0x55   : > { %p308_p4 = scmp.lt.s32.totalorder %s968_s25, 1  ;;  %v908_v0 = vmov 0.0   ;;  %v318_v2 = vld [vmem:[%s267_s17] sm:$0xff]  ;;  %v754_v4 = vld [vmem:[#allocation5] sm:$0xff]   ;;  %v755_v6 = vld [vmem:[#allocation5 + $0x8] sm:$0xff]   ;;  %vm909_vm0 = vmmov 0   ;;  %v353_v28 = vlaneseq }
  0x56   : > { %883 = vsyncadd (%p1194_p1), [#allocation6], 4294966272  ;;  %668 = vmatprep.subr.bf16.mxu0 %v908_v0  ;;  %v343_v5 = vmul.f32 %v318_v2, %v318_v2  ;;  %v756_v7 = vld [vmem:[#allocation5 + $0x10] sm:$0xff]   ;;  %v757_v8 = vld [vmem:[#allocation5 + $0x18] sm:$0xff]   ;;  %684 = vmatprep.mubr.msk.bf16.mxu0 %vm909_vm0, %v908_v0  ;;  %v910_v12 = vmov 0   ;;  %vm502_vm8 = vcmask 7168  }
  0x57   : > { %s1100_s29 = scalar_select %p308_p4, %s968_s25, 1  ;;  %669 = vmatpush3.bf16.xpose.msra.mxu0 %v754_v4  ;;  %v758_v10 = vld [vmem:[#allocation5 + $0x20] sm:$0xff]   ;;  %v759_v11 = vld [vmem:[#allocation5 + $0x28] sm:$0xff]   ;;  %753 = vset.pattern.permute.xlu1 %v910_v12  ;;  %v760_v14 = vld [vmem:[#allocation5 + $0x30] sm:$0xff]   ;;  %v354_v30 = vshrl.u32 %v353_v28, 7 }
  0x58   : > { %670 = vmatprep.subr.bf16.mxu0 %v908_v0  ;;  %752 = vset.pattern.permute.xlu0 %v910_v12  ;;  %v761_v15 = vld [vmem:[#allocation5 + $0x38] sm:$0xff]   ;;  %v320_v31 = vld [vmem:[%s1175_s1] sm:$0x1]  ;;  %s307_s17 = scalar_lea.vmem [#allocation7], %s640_s12  ;;  %s516_s8 = scalar_lea.sflag [#allocation4], %s1083_s26 }
  0x59   : > { %s643_s19 = sshll.u32 %s1100_s29, 3  ;;  %v355_v32 = vsub.s32 0, %v354_v30  ;;  %vm365_vm2 = vcmp.ge.s32.totalorder %v320_v31, 0  ;;  %v653_v35 = vld [vmem:[%s1179_s5] ss:$0 sm:$0xff]  ;;  %s529_s29 = sshll.u32 %s307_s17, 4  ;;  %s1127_s29 = int_to_ptr.vmem [resolvable:$true] %s529_s29 }
  0x5a   : > { %s315_s27 = scalar_lea.vmem %s1176_s2, %s643_s19  ;;  %s311_s15 = scalar_lea.vmem %s1174_s0, %s643_s19  ;;  %v366_v40 = vsel %vm365_vm2, 1, %v910_v12 }
  0x5b   : > { %v317_v1 = vld [vmem:[%s315_s27] sm:$0xff]  ;;  %v356_v39 = vrot.slane %v320_v31, %v355_v32  ;;  %v370_v49 = vrot.slane %v366_v40, %v355_v32  ;;  %s656_s19 = sshll.u32 %s968_s25, 7  ;;  %s911_s25 = smov [#allocation7]  }
  0x5c   : > { %v338_v3 = vmul.f32 %v317_v1, %v317_v1  ;;  %v486_v9 = vmul.f32 %v318_v2, %v317_v1  ;;  %v319_v13 = vld [vmem:[%s311_s15] sm:$0xff]  ;;  %s1132_s20 = scalar_lea.hbm %s1180_s6, %s656_s19  ;;  %s832_s15 = scalar_lea.vmem %s1127_s29, 128 }
  0x5d   : > { %vm358_vm1 = vcmp.ge.s32.totalorder %v319_v13, 0  ;;  %vm371_vm5 = vcmp.eq.s32.totalorder %v370_v49, 1  ;;  %p833_p6 = scmp.ne.s32.totalorder %s1127_s29, %s832_s15  ;;  %s836_s12 = sshll.u32 %s911_s25, 4  ;;  %s837_s12 = int_to_ptr.vmem [resolvable:$false] %s836_s12 }
  0x5e   : > { %339 = vadd.xlane.f32.xlu0 %v338_v3  ;;  %487 = vadd.xlane.f32.xlu1 %v486_v9  ;;  %v359_v27 = vsel %vm358_vm1, 1, %v910_v12  ;;  %s838_s18 = scalar_lea.vmem %s837_s12, 256  ;;  %p839_p13 = scmp.lt.s32.totalorder %s1127_s29, %s837_s12 }
  0x5f   : > { %671 = vmatpush3.bf16.xpose.msra.mxu0 %v755_v6  ;;  %p834_p8 = pnand %p833_p6, %p1038_p12  ;;  %p840_p3 = scmp.lt.s32.totalorder %s838_s18, %s832_s15 }
  0x60   : > { %672 = vmatprep.subr.bf16.mxu0 %v908_v0 }
  0x61   : > { %p835_p10 = pneg %p834_p8  ;;  %p841_p7 = por %p840_p3, %p839_p13 }
  0x62   : > { %344 = vadd.xlane.f32.xlu0 %v343_v5 }
  0x63   : > { %p842_p9 = pnand %p841_p7, %p835_p10 }
  0x67   : > { %673 = vmatpush3.bf16.xpose.msra.mxu0 %v756_v7 }
  0x68   : > { %674 = vmatprep.subr.bf16.mxu0 %v908_v0 }
  0x6f   : > { %675 = vmatpush3.bf16.xpose.msra.mxu0 %v757_v8 }
  0x70   : > { %676 = vmatprep.subr.bf16.mxu0 %v908_v0 }
  0x77   : > { %677 = vmatpush3.bf16.xpose.msra.mxu0 %v758_v10 }
  0x78   : > { %678 = vmatprep.subr.bf16.mxu0 %v908_v0  ;;  %351 = vperm.xlu0 %752, %v319_v13  }
  0x7f   : > { %679 = vmatpush3.bf16.xpose.msra.mxu0 %v759_v11 }
  0x80   : > { %680 = vmatprep.subr.bf16.mxu0 %v908_v0 }
  0x87   : > { %681 = vmatpush3.bf16.xpose.msra.mxu0 %v760_v14 }
  0x88   : > { %682 = vmatprep.subr.bf16.mxu0 %v908_v0 }
  0x8f   : > { %683 = vmatpush3.bf16.xpose.msra.mxu0 %v761_v15 }
  0xeb   : > { %v340_v16 = vpop.xlane.xlu0 %339  ;;  %v488_v29 = vpop.xlane.xlu1 %487 }
  0xec   : > { %v341_v17 = vmax.f32 %v340_v16, 1e-24 }
  0xee   : > { %762 = vrsqrt.f32 %v341_v17 }
  0xef   : > { %v345_v18 = vpop.xlane.xlu0 %344 }
  0xf0   : > { %v346_v19 = vmax.f32 %v345_v18, 1e-24 }
  0xf2   : > { %764 = vrsqrt.f32 %v346_v19 }
  0xf7   : > { %v352_v41 = vpop.permute.xlu0 %351 }
  0xf8   : > { %v763_v20 = vpop.eup %762  ;;  %vm357_vm4 = vcmp.ne.s32.totalorder %v352_v41, %v356_v39 }
  0xf9   : > { %v348_v22 = vmul.f32 %v763_v20, %v317_v1 }
  0xfc   : > { %v765_v21 = vpop.eup %764 }
  0xfd   : > { %v349_v23 = vmul.f32 %v765_v21, %v318_v2 }
  0xff   : > { %v472_v24 = vmul.f32 %v349_v23, %v348_v22  ;;  %v374_v25 = vadd.f32 %v349_v23, %v348_v22 }
 0x101   : > { %473 = vadd.xlane.f32.xlu1 %v472_v24  ;;  %v375_v26 = vpack.c.bf16 %v374_v25, %v317_v1 }
 0x103   : > { %685 = vmatmul.mubr.bf16.vlgmr.msra.gmra.mrb[0].mxu0 %v375_v26 }
 0x112   : > { %361 = vperm.xlu1 %753, %v359_v27  }
 0x18e   : > { %v474_v33 = vpop.xlane.xlu1 %473 }
 0x18f   : > { %v475_v46 = vmul.f32 4.0, %v474_v33 }
 0x192   : > { %v362_v45 = vpop.permute.xlu1 %361 }
 0x193   : > { %vm363_vm3 = vcmp.eq.s32.totalorder %v362_v45, 1 }
 0x194   : > { %vm364_vm6 = vmand %vm357_vm4, %vm363_vm3 }
 0x195   : > { %vm372_vm7 = vmand %vm364_vm6, %vm371_vm5 }
 0x196   : > { %v373_v52 = vsel %vm372_vm7, 1.0, %v908_v0 }
 0x1d6   : > { %v458_v34 = vpop.f32.mrb[0].mxu0 }
 0x1d7   : > { %v489_v36 = vsub.f32 %v458_v34, %v488_v29  ;;  %v686_v37 = vpop.f32.mrb[1].mxu0 }
 0x1d8   : > { %v461_v38 = vpop.f32.mrb[2].mxu0 }
 0x1d9   : > { %v654_v42 = vclamps-f32 %v489_v36, 50.0  ;;  %v471_v43 = vmul.f32 %v653_v35, %v461_v38  ;;  %v687_v44 = vpop.f32.mrb[3].mxu0 }
 0x1db   : > { %v492_v47 = vmul.f32 1.442695, %v654_v42  ;;  %v476_v48 = vmul.f32 4.0, %v471_v43 }
 0x1dd   : > { %766 = vpow2.f32 %v492_v47  ;;  %v477_v50 = vsub.f32 %v476_v48, %v475_v46 }
 0x1df   : > { %v478_v51 = vmul.f32 1.442695, %v477_v50 }
 0x1e1   : > { %768 = vpow2.f32 %v478_v51 }
 0x1e7   : > { %v767_v53 = vpop.eup %766 }
 0x1e8   : > { %v494_v54 = vmul.f32 %v767_v53, %v373_v52 }
 0x1ea   : > { %495 = vadd.xlane.f32.xlu0 %v494_v54 }
 0x1eb   : > { %v769_v55 = vpop.eup %768 }
 0x1ec   : > { %v480_v56 = vmul.f32 %v769_v55, %v373_v52 }
 0x1ee   : > { %481 = vadd.xlane.f32.xlu1 %v480_v56 }
 0x277   : > { %v496_v57 = vpop.xlane.xlu0 %495 }
 0x278   : > { %v497_v58 = vadd.f32 1.0, %v496_v57 }
 0x27a   : > { %770 = vlog2.f32 %v497_v58 }
 0x27b   : > { %v482_v59 = vpop.xlane.xlu1 %481 }
 0x27c   : > { %v483_v60 = vadd.f32 1.0, %v482_v59 }
 0x27e   : > { %772 = vlog2.f32 %v483_v60 }
 0x284   : > { %v771_v61 = vpop.eup %770 }
 0x285   : > { %v499_v1 = vmul.f32 0.6931472, %v771_v61 }
 0x288   : > { %v773_v62 = vpop.eup %772 }
 0x289   : > { %v485_v63 = vmul.f32 0.6931472, %v773_v62 }
 0x28b   : > { %v500_v2 = vmul.f32 2.0, %v485_v63 }
 0x28d   : > { %v501_v0 = vadd.f32 %v500_v2, %v499_v1 }
 0x28f   : > { %v503_v3 = vsel %vm502_vm8, %v501_v0, 0.0 }
 0x290   : > { %504 = vadd.xlane.f32.xlu1 %v503_v3 }
 0x31d   : > { %v505_v4 = vpop.xlane.xlu1 %504 }
 0x31e   : > { %v506_v5 = vrot.slane %v505_v4, 4 }
 0x320   : > { %v507_v6 = vadd.f32 %v506_v5, %v505_v4 }
 0x322   : > { %v508_v7 = vrot.slane %v507_v6, 2 }
 0x324   : > { %v509_v8 = vadd.f32 %v508_v7, %v507_v6 }
 0x326   : > { %v510_v9 = vrot.slane %v509_v8, 1 }
 0x328   : > { %v511_v10 = vadd.f32 %v510_v9, %v509_v8 }
 0x32a   : > { %688 = vpush %v511_v10 }
 0x35b   : > { %s689_s10 = spop %688 }
 0x35c   : > { %v513_v11 = vstv %s689_s10 }
 0x35d   : > { %514 = vst [vmem:[%s307_s17] sm:$0xff] %v513_v11 }
 0x35e   : > { %845 = shalt.err (!%p842_p9)
}
 0x35f   : > { %s846_s26 = scalar_lea.hbm %s1132_s20, 128  ;;  %s850_s16 = scalar_lea.hbm %s1180_s6, 256 }
 0x360   : > { %p847_p2 = scmp.ne.s32.totalorder %s1132_s20, %s846_s26  ;;  %p851_p11 = scmp.lt.u32.totalorder %s1132_s20, %s1180_s6 }
 0x361   : > { %p852_p1 = scmp.lt.u32.totalorder %s850_s16, %s846_s26  ;;  %p854_p6 = scmp.lt.u32.totalorder %s846_s26, %s1132_s20 }
 0x362   : > { %p848_p5 = pnand %p847_p2, %p1038_p12 }
 0x363   : > { %p853_p4 = por %p852_p1, %p851_p11 }
 0x364   : > { %p849_p0 = pneg %p848_p5 }
 0x365   : > { %p855_p8 = por %p854_p6, %p853_p4 }
 0x367   : > { %p856_p10 = pnand %p855_p8, %p849_p0 }
 0x369   : > { %859 = shalt.err (!%p856_p10)
}
 0x36a   : > { %696 = dma.vmem_to_hbm [thread:$0]  (%p1038_p12), %s1127_s29, 128, %s1132_s20, %s516_s8  }
 0x36b PF: > { %s541_s10 = sand.u32 1, %s890_s21   ;;  %p1195_p13 = scmp.ne.s32.totalorder %s1185_s28, 0 }
 0x36c   : > { %p1196_p3 = scmp.ge.s32.totalorder %s902_s24, 2  ;;  %s542_s11 = scalar_lea.sflag [#allocation4], %s541_s10 }
 0x36e   : > { %p707_p7 = pnand %p1196_p3, %p1195_p13 }
 0x370   : > { %885 = dma.done.wait (!%p707_p7), %s542_s11, 128  }
 0x371   : > { %887 = vsyncadd (!%p707_p7), %s542_s11, 4294967168  ;;  %p20_p9 = scmp.ge.s32.totalorder %s1003_s9, 4   ;;  %s1197_s21 = smov %s894_s22 }
 0x372   : > { %s1198_s22 = smov %s898_s23  ;;  %s1199_s23 = smov %s1034_s13 }
 0x373   : > { %s1200_s24 = smov %s1003_s9  ;;  %22 = sbr.rel (!%p20_p9) target bundleno = 6 (0x6), region = 99 }
 0x37a   :  { %547 = vsyncpa [#allocation3], 1 }
 0x37b   :  { %549 = vsyncpa [#allocation3 + $0x1], 1 }
 0x37c   :  { %550 = vsyncpa [#allocation6], 1 }
 0x37d   :  { %551 = vsyncpa [#allocation4], 1 }
 0x37e   :  { %553 = vsyncpa [#allocation4 + $0x1], 1 }

// kernel: tpu_custom_call.1
= control target key start
LH: loop header
LB: loop body
LE: loop exit
PB: predicated region body
PF: predicated region fallthrough
CT: control target
= control target key end

     0   :  { %11 = vsyncpa [#allocation3], 0  ;;  %s1174_s0 = inlined_call_operand.vmem [shape: s32[16,1], index: 0, kind: input, shape index: {}]   ;;  %s1175_s1 = inlined_call_operand.vmem [shape: s32[1,128], index: 1, kind: input, shape index: {}]   ;;  %s1176_s2 = inlined_call_operand.vmem [shape: f32[16,128], index: 2, kind: input, shape index: {}]   ;;  %s1177_s3 = inlined_call_operand.hbm [shape: f32[16,128], index: 3, kind: input, shape index: {}]   ;;  %s1178_s4 = inlined_call_operand.hbm [shape: bf16[128,128], index: 4, kind: input, shape index: {}]   ;;  %s1179_s5 = inlined_call_operand.vmem [shape: f32[1,128], index: 5, kind: input, shape index: {}]   ;;  %s1180_s6 = inlined_call_operand.hbm [shape: f32[16,128], index: 6, kind: output, shape index: {}]  }
   0x1   :  { %13 = vsyncpa [#allocation3 + $0x1], 0 }
   0x2   :  { %14 = vsyncpa [#allocation6], 0 }
   0x3   :  { %15 = vsyncpa [#allocation4], 0 }
   0x4   :  { %17 = vsyncpa [#allocation4 + $0x1], 0  ;;  %s947_s21 = smov 0   ;;  %s949_s22 = smov 0  }
   0x5   :  { %s951_s23 = smov 0   ;;  %s953_s24 = smov 0  }
   0x6 LB: > { %s968_s25 = sadd.s32 4294967295, %s902_s24   ;;  %s633_s26 = sadd.s32 4294967294, %s902_s24   ;;  %s902_s24 = sphi %s953_s24, %s1200_s24   ;;  %s898_s23 = sphi %s951_s23, %s1199_s23   ;;  %s894_s22 = sphi %s949_s22, %s1198_s22   ;;  %s890_s21 = sphi %s947_s21, %s1197_s21  }
   0x7   : > { %p116_p0 = scmp.ne.s32.totalorder %s894_s22, %s890_s21  ;;  %p1181_p1 = scmp.eq.s32.totalorder %s968_s25, 0 }
   0x8   : > { %p188_p3 = scmp.eq.s32.totalorder %s633_s26, 1  ;;  %p634_p5 = scmp.ge.s32.totalorder %s902_s24, 1 }
   0x9   : > { %p977_p4 = por %p1181_p1, %p116_p0  ;;  %p195_p7 = scmp.lt.s32.totalorder %s902_s24, 3 }
   0xa   : > { %p982_p6 = por %p188_p3, %p116_p0  ;;  %s904_s30 = smov [#allocation5]  }
   0xb   : > { %s1184_s27 = scalar_select %p977_p4, 1, 0 }
   0xc   : > { %s1185_s28 = scalar_select %p982_p6, 1, 0 }
   0xd   : > { %p987_p8 = pnand %p634_p5, %p195_p7  ;;  %s210_s7 = sshll.u32 %s904_s30, 4  ;;  %s991_s7 = int_to_ptr.vmem [resolvable:$true] %s210_s7 }
   0xe   : > { %s1003_s9 = sadd.s32 1, %s902_s24   ;;  %s103_s10 = sadd.s32 1, %s898_s23 }
   0xf   : > { %s1186_s29 = scalar_select %p987_p8, 1, 0 }
  0x10   : > { %p698_p9 = pneg %p987_p8  ;;  %s100_s11 = ssub.s32 %s902_s24, %s1003_s9 }
  0x11   : > { %s774_s14 = scalar_lea.hbm %s1178_s4, 1024 }
  0x12   : > { %p998_p11 = pnand %p698_p9, %p1181_p1  ;;  %p775_p12 = scmp.ne.s32.totalorder %s1178_s4, %s774_s14 }
  0x13   : > { %p781_p5 = scmp.lt.u32.totalorder %s774_s14, %s1178_s4 }
  0x14   : > { %p776_p13 = pneg %p998_p11 }
  0x16   : > { %p777_p0 = pnand %p776_p13, %p775_p12 }
  0x18   : > { %p778_p3 = pneg %p777_p0 }
  0x1a   : > { %p783_p7 = pnand %p781_p5, %p778_p3 }
  0x1c   : > { %786 = shalt.err (!%p783_p7)
}
  0x1d   : > { %s787_s19 = scalar_lea.vmem %s991_s7, 1024  ;;  %p795_p2 = scmp.lt.s32.totalorder %s991_s7, %s991_s7 }
  0x1e   : > { %p788_p9 = scmp.ne.s32.totalorder %s991_s7, %s787_s19  ;;  %p796_p6 = scmp.lt.s32.totalorder %s787_s19, %s787_s19 }
  0x20   : > { %p790_p10 = pnand %p788_p9, %p776_p13  ;;  %p797_p4 = por %p796_p6, %p795_p2 }
  0x22   : > { %p791_p1 = pneg %p790_p10 }
  0x24   : > { %p798_p8 = pnand %p797_p4, %p791_p1 }
  0x26   : > { %801 = shalt.err (!%p798_p8)
}
  0x27   : > { %s905_s20 = smov 64   ;;  %s906_s26 = smov 4  }
  0x28   : > { %701 = dma.hbm_to_vmem [thread:$0]  (!%p998_p11), %s1178_s4, 1024, %s991_s7, [#allocation6], %s905_s20, %s905_s20, %s906_s26  }
  0x29   : > { %p101_p2 = scmp.eq.s32.totalorder %s100_s11, 0  ;;  %p110_p1 = scmp.ne.s32.totalorder %s898_s23, %s894_s22 }
  0x2a   : > { %p111_p4 = scmp.eq.s32.totalorder %s902_s24, 0  ;;  %p711_p6 = scmp.lt.s32.totalorder %s902_s24, 2 }
  0x2b   : > { %s1034_s13 = scalar_select %p101_p2, %s898_s23, %s103_s10  }
  0x2c   : > { %p112_p8 = por %p111_p4, %p110_p1  ;;  %p1188_p10 = scmp.eq.s32.totalorder %s968_s25, 1 }
  0x2d   : > { %s241_s15 = sand.u32 1, %s898_s23   ;;  %s638_s16 = sshll.u32 %s902_s24, 7 }
  0x2e   : > { %p1038_p12 = por %p1188_p10, %p110_p1  ;;  %s637_s17 = sshll.u32 %s241_s15, 3 }
  0x2f   : > { %s1047_s19 = scalar_lea.hbm %s1177_s3, %s638_s16  ;;  %s245_s7 = scalar_lea.vmem [#allocation2], %s637_s17 }
  0x30   : > { %s252_s10 = sshll.u32 %s245_s7, 4  ;;  %p1049_p11 = pnand %p711_p6, %p112_p8  ;;  %s1053_s10 = int_to_ptr.vmem [resolvable:$true] %s252_s10 }
  0x31   : > { %s242_s20 = scalar_lea.sflag [#allocation3], %s241_s15  ;;  %s802_s26 = scalar_lea.hbm %s1047_s19, 128 }
  0x32   : > { %p803_p13 = scmp.ne.s32.totalorder %s1047_s19, %s802_s26  ;;  %p804_p0 = pneg %p1049_p11 }
  0x33   : > { %s807_s16 = scalar_lea.hbm %s1177_s3, 256  ;;  %p808_p7 = scmp.lt.u32.totalorder %s1047_s19, %s1177_s3 }
  0x34   : > { %p805_p3 = pnand %p804_p0, %p803_p13  ;;  %p809_p9 = scmp.lt.u32.totalorder %s807_s16, %s802_s26 }
  0x35   : > { %p811_p1 = scmp.lt.u32.totalorder %s802_s26, %s1047_s19 }
  0x36   : > { %p806_p5 = pneg %p805_p3  ;;  %p810_p2 = por %p809_p9, %p808_p7 }
  0x38   : > { %p812_p4 = por %p811_p1, %p810_p2 }
  0x3a   : > { %p813_p6 = pnand %p812_p4, %p806_p5 }
  0x3c   : > { %816 = shalt.err (!%p813_p6)
}
  0x3d   : > { %s817_s15 = scalar_lea.vmem %s1053_s10, 128  ;;  %s907_s18 = smov [#allocation2]  }
  0x3e   : > { %p818_p8 = scmp.ne.s32.totalorder %s1053_s10, %s817_s15  ;;  %s822_s7 = sshll.u32 %s907_s18, 4  ;;  %s823_s7 = int_to_ptr.vmem [resolvable:$false] %s822_s7 }
  0x3f   : > { %s824_s30 = scalar_lea.vmem %s823_s7, 256  ;;  %p825_p3 = scmp.lt.s32.totalorder %s1053_s10, %s823_s7 }
  0x40   : > { %p820_p10 = pnand %p818_p8, %p804_p0  ;;  %p826_p7 = scmp.lt.s32.totalorder %s824_s30, %s817_s15 }
  0x42   : > { %p821_p13 = pneg %p820_p10  ;;  %p827_p9 = por %p826_p7, %p825_p3 }
  0x44   : > { %p828_p2 = pnand %p827_p9, %p821_p13 }
  0x46   : > { %831 = shalt.err (!%p828_p2)
}
  0x47   : > { %705 = dma.hbm_to_vmem [thread:$0]  (!%p1049_p11), %s1047_s19, 128, %s1053_s10, %s242_s20  }
  0x48   : > { %p1191_p5 = scmp.ne.s32.totalorder %s1186_s29, 0 }
  0x49   : > { %s1083_s26 = sand.u32 (!%p1191_p5), 1, %s894_s22   ;;  %p1192_p0 = scmp.ne.s32.totalorder (!%p1191_p5), %s1184_s27, 0 }
  0x4a   : > { %261 = sbr.rel (%p1191_p5) target bundleno = 875 (0x36b), region = 44  ;;  %s640_s12 = sshll.u32 (!%p1191_p5), %s1083_s26, 3 }
  0x4b   : > { %s264_s16 = scalar_lea.sflag (!%p1191_p5), [#allocation3], %s1083_s26  ;;  %s267_s17 = scalar_lea.vmem (!%p1191_p5), [#allocation2], %s640_s12 }
  0x51   : > { %877 = dma.done.wait (%p1192_p0), %s264_s16, 128  }
  0x52   : > { %879 = vsyncadd (%p1192_p0), %s264_s16, 4294967168  ;;  %p1193_p11 = scmp.eq.s32.totalorder %s968_s25, 0 }
  0x54   : > { %881 = dma.done.wait (%p1193_p11), [#allocation6], 1024   ;;  %p1194_p1 = pmov %p1193_p11 }
  0x55   : > { %p308_p4 = scmp.lt.s32.totalorder %s968_s25, 1  ;;  %v908_v0 = vmov 0.0   ;;  %v318_v2 = vld [vmem:[%s267_s17] sm:$0xff]  ;;  %v754_v4 = vld [vmem:[#allocation5] sm:$0xff]   ;;  %v755_v6 = vld [vmem:[#allocation5 + $0x8] sm:$0xff]   ;;  %vm909_vm0 = vmmov 0   ;;  %v353_v28 = vlaneseq }
  0x56   : > { %883 = vsyncadd (%p1194_p1), [#allocation6], 4294966272  ;;  %668 = vmatprep.subr.bf16.mxu0 %v908_v0  ;;  %v343_v5 = vmul.f32 %v318_v2, %v318_v2  ;;  %v756_v7 = vld [vmem:[#allocation5 + $0x10] sm:$0xff]   ;;  %v757_v8 = vld [vmem:[#allocation5 + $0x18] sm:$0xff]   ;;  %684 = vmatprep.mubr.msk.bf16.mxu0 %vm909_vm0, %v908_v0  ;;  %v910_v12 = vmov 0   ;;  %vm502_vm8 = vcmask 7168  }
  0x57   : > { %s1100_s29 = scalar_select %p308_p4, %s968_s25, 1  ;;  %669 = vmatpush3.bf16.xpose.msra.mxu0 %v754_v4  ;;  %v758_v10 = vld [vmem:[#allocation5 + $0x20] sm:$0xff]   ;;  %v759_v11 = vld [vmem:[#allocation5 + $0x28] sm:$0xff]   ;;  %753 = vset.pattern.permute.xlu1 %v910_v12  ;;  %v760_v14 = vld [vmem:[#allocation5 + $0x30] sm:$0xff]   ;;  %v354_v30 = vshrl.u32 %v353_v28, 7 }
  0x58   : > { %670 = vmatprep.subr.bf16.mxu0 %v908_v0  ;;  %752 = vset.pattern.permute.xlu0 %v910_v12  ;;  %v761_v15 = vld [vmem:[#allocation5 + $0x38] sm:$0xff]   ;;  %v320_v31 = vld [vmem:[%s1175_s1] sm:$0x1]  ;;  %s307_s17 = scalar_lea.vmem [#allocation7], %s640_s12  ;;  %s516_s8 = scalar_lea.sflag [#allocation4], %s1083_s26 }
  0x59   : > { %s643_s19 = sshll.u32 %s1100_s29, 3  ;;  %v355_v32 = vsub.s32 0, %v354_v30  ;;  %vm365_vm2 = vcmp.ge.s32.totalorder %v320_v31, 0  ;;  %v653_v35 = vld [vmem:[%s1179_s5] ss:$0 sm:$0xff]  ;;  %s529_s29 = sshll.u32 %s307_s17, 4  ;;  %s1127_s29 = int_to_ptr.vmem [resolvable:$true] %s529_s29 }
  0x5a   : > { %s315_s27 = scalar_lea.vmem %s1176_s2, %s643_s19  ;;  %s311_s15 = scalar_lea.vmem %s1174_s0, %s643_s19  ;;  %v366_v40 = vsel %vm365_vm2, 1, %v910_v12 }
  0x5b   : > { %v317_v1 = vld [vmem:[%s315_s27] sm:$0xff]  ;;  %v356_v39 = vrot.slane %v320_v31, %v355_v32  ;;  %v370_v49 = vrot.slane %v366_v40, %v355_v32  ;;  %s656_s19 = sshll.u32 %s968_s25, 7  ;;  %s911_s25 = smov [#allocation7]  }
  0x5c   : > { %v338_v3 = vmul.f32 %v317_v1, %v317_v1  ;;  %v486_v9 = vmul.f32 %v318_v2, %v317_v1  ;;  %v319_v13 = vld [vmem:[%s311_s15] sm:$0xff]  ;;  %s1132_s20 = scalar_lea.hbm %s1180_s6, %s656_s19  ;;  %s832_s15 = scalar_lea.vmem %s1127_s29, 128 }
  0x5d   : > { %vm358_vm1 = vcmp.ge.s32.totalorder %v319_v13, 0  ;;  %vm371_vm5 = vcmp.eq.s32.totalorder %v370_v49, 1  ;;  %p833_p6 = scmp.ne.s32.totalorder %s1127_s29, %s832_s15  ;;  %s836_s12 = sshll.u32 %s911_s25, 4  ;;  %s837_s12 = int_to_ptr.vmem [resolvable:$false] %s836_s12 }
  0x5e   : > { %339 = vadd.xlane.f32.xlu0 %v338_v3  ;;  %487 = vadd.xlane.f32.xlu1 %v486_v9  ;;  %v359_v27 = vsel %vm358_vm1, 1, %v910_v12  ;;  %s838_s18 = scalar_lea.vmem %s837_s12, 256  ;;  %p839_p13 = scmp.lt.s32.totalorder %s1127_s29, %s837_s12 }
  0x5f   : > { %671 = vmatpush3.bf16.xpose.msra.mxu0 %v755_v6  ;;  %p834_p8 = pnand %p833_p6, %p1038_p12  ;;  %p840_p3 = scmp.lt.s32.totalorder %s838_s18, %s832_s15 }
  0x60   : > { %672 = vmatprep.subr.bf16.mxu0 %v908_v0 }
  0x61   : > { %p835_p10 = pneg %p834_p8  ;;  %p841_p7 = por %p840_p3, %p839_p13 }
  0x62   : > { %344 = vadd.xlane.f32.xlu0 %v343_v5 }
  0x63   : > { %p842_p9 = pnand %p841_p7, %p835_p10 }
  0x67   : > { %673 = vmatpush3.bf16.xpose.msra.mxu0 %v756_v7 }
  0x68   : > { %674 = vmatprep.subr.bf16.mxu0 %v908_v0 }
  0x6f   : > { %675 = vmatpush3.bf16.xpose.msra.mxu0 %v757_v8 }
  0x70   : > { %676 = vmatprep.subr.bf16.mxu0 %v908_v0 }
  0x77   : > { %677 = vmatpush3.bf16.xpose.msra.mxu0 %v758_v10 }
  0x78   : > { %678 = vmatprep.subr.bf16.mxu0 %v908_v0  ;;  %351 = vperm.xlu0 %752, %v319_v13  }
  0x7f   : > { %679 = vmatpush3.bf16.xpose.msra.mxu0 %v759_v11 }
  0x80   : > { %680 = vmatprep.subr.bf16.mxu0 %v908_v0 }
  0x87   : > { %681 = vmatpush3.bf16.xpose.msra.mxu0 %v760_v14 }
  0x88   : > { %682 = vmatprep.subr.bf16.mxu0 %v908_v0 }
  0x8f   : > { %683 = vmatpush3.bf16.xpose.msra.mxu0 %v761_v15 }
  0xeb   : > { %v340_v16 = vpop.xlane.xlu0 %339  ;;  %v488_v29 = vpop.xlane.xlu1 %487 }
  0xec   : > { %v341_v17 = vmax.f32 %v340_v16, 1e-24 }
  0xee   : > { %762 = vrsqrt.f32 %v341_v17 }
  0xef   : > { %v345_v18 = vpop.xlane.xlu0 %344 }
  0xf0   : > { %v346_v19 = vmax.f32 %v345_v18, 1e-24 }
  0xf2   : > { %764 = vrsqrt.f32 %v346_v19 }
  0xf7   : > { %v352_v41 = vpop.permute.xlu0 %351 }
  0xf8   : > { %v763_v20 = vpop.eup %762  ;;  %vm357_vm4 = vcmp.ne.s32.totalorder %v352_v41, %v356_v39 }
  0xf9   : > { %v348_v22 = vmul.f32 %v763_v20, %v317_v1 }
  0xfc   : > { %v765_v21 = vpop.eup %764 }
  0xfd   : > { %v349_v23 = vmul.f32 %v765_v21, %v318_v2 }
  0xff   : > { %v472_v24 = vmul.f32 %v349_v23, %v348_v22  ;;  %v374_v25 = vadd.f32 %v349_v23, %v348_v22 }
 0x101   : > { %473 = vadd.xlane.f32.xlu1 %v472_v24  ;;  %v375_v26 = vpack.c.bf16 %v374_v25, %v317_v1 }
 0x103   : > { %685 = vmatmul.mubr.bf16.vlgmr.msra.gmra.mrb[0].mxu0 %v375_v26 }
 0x112   : > { %361 = vperm.xlu1 %753, %v359_v27  }
 0x18e   : > { %v474_v33 = vpop.xlane.xlu1 %473 }
 0x18f   : > { %v475_v46 = vmul.f32 4.0, %v474_v33 }
 0x192   : > { %v362_v45 = vpop.permute.xlu1 %361 }
 0x193   : > { %vm363_vm3 = vcmp.eq.s32.totalorder %v362_v45, 1 }
 0x194   : > { %vm364_vm6 = vmand %vm357_vm4, %vm363_vm3 }
 0x195   : > { %vm372_vm7 = vmand %vm364_vm6, %vm371_vm5 }
 0x196   : > { %v373_v52 = vsel %vm372_vm7, 1.0, %v908_v0 }
 0x1d6   : > { %v458_v34 = vpop.f32.mrb[0].mxu0 }
 0x1d7   : > { %v489_v36 = vsub.f32 %v458_v34, %v488_v29  ;;  %v686_v37 = vpop.f32.mrb[1].mxu0 }
 0x1d8   : > { %v461_v38 = vpop.f32.mrb[2].mxu0 }
 0x1d9   : > { %v654_v42 = vclamps-f32 %v489_v36, 50.0  ;;  %v471_v43 = vmul.f32 %v653_v35, %v461_v38  ;;  %v687_v44 = vpop.f32.mrb[3].mxu0 }
 0x1db   : > { %v492_v47 = vmul.f32 1.442695, %v654_v42  ;;  %v476_v48 = vmul.f32 4.0, %v471_v43 }
 0x1dd   : > { %766 = vpow2.f32 %v492_v47  ;;  %v477_v50 = vsub.f32 %v476_v48, %v475_v46 }
 0x1df   : > { %v478_v51 = vmul.f32 1.442695, %v477_v50 }
 0x1e1   : > { %768 = vpow2.f32 %v478_v51 }
 0x1e7   : > { %v767_v53 = vpop.eup %766 }
 0x1e8   : > { %v494_v54 = vmul.f32 %v767_v53, %v373_v52 }
 0x1ea   : > { %495 = vadd.xlane.f32.xlu0 %v494_v54 }
 0x1eb   : > { %v769_v55 = vpop.eup %768 }
 0x1ec   : > { %v480_v56 = vmul.f32 %v769_v55, %v373_v52 }
 0x1ee   : > { %481 = vadd.xlane.f32.xlu1 %v480_v56 }
 0x277   : > { %v496_v57 = vpop.xlane.xlu0 %495 }
 0x278   : > { %v497_v58 = vadd.f32 1.0, %v496_v57 }
 0x27a   : > { %770 = vlog2.f32 %v497_v58 }
 0x27b   : > { %v482_v59 = vpop.xlane.xlu1 %481 }
 0x27c   : > { %v483_v60 = vadd.f32 1.0, %v482_v59 }
 0x27e   : > { %772 = vlog2.f32 %v483_v60 }
 0x284   : > { %v771_v61 = vpop.eup %770 }
 0x285   : > { %v499_v1 = vmul.f32 0.6931472, %v771_v61 }
 0x288   : > { %v773_v62 = vpop.eup %772 }
 0x289   : > { %v485_v63 = vmul.f32 0.6931472, %v773_v62 }
 0x28b   : > { %v500_v2 = vmul.f32 2.0, %v485_v63 }
 0x28d   : > { %v501_v0 = vadd.f32 %v500_v2, %v499_v1 }
 0x28f   : > { %v503_v3 = vsel %vm502_vm8, %v501_v0, 0.0 }
 0x290   : > { %504 = vadd.xlane.f32.xlu1 %v503_v3 }
 0x31d   : > { %v505_v4 = vpop.xlane.xlu1 %504 }
 0x31e   : > { %v506_v5 = vrot.slane %v505_v4, 4 }
 0x320   : > { %v507_v6 = vadd.f32 %v506_v5, %v505_v4 }
 0x322   : > { %v508_v7 = vrot.slane %v507_v6, 2 }
 0x324   : > { %v509_v8 = vadd.f32 %v508_v7, %v507_v6 }
 0x326   : > { %v510_v9 = vrot.slane %v509_v8, 1 }
 0x328   : > { %v511_v10 = vadd.f32 %v510_v9, %v509_v8 }
 0x32a   : > { %688 = vpush %v511_v10 }
 0x35b   : > { %s689_s10 = spop %688 }
 0x35c   : > { %v513_v11 = vstv %s689_s10 }
 0x35d   : > { %514 = vst [vmem:[%s307_s17] sm:$0xff] %v513_v11 }
 0x35e   : > { %845 = shalt.err (!%p842_p9)
}
 0x35f   : > { %s846_s26 = scalar_lea.hbm %s1132_s20, 128  ;;  %s850_s16 = scalar_lea.hbm %s1180_s6, 256 }
 0x360   : > { %p847_p2 = scmp.ne.s32.totalorder %s1132_s20, %s846_s26  ;;  %p851_p11 = scmp.lt.u32.totalorder %s1132_s20, %s1180_s6 }
 0x361   : > { %p852_p1 = scmp.lt.u32.totalorder %s850_s16, %s846_s26  ;;  %p854_p6 = scmp.lt.u32.totalorder %s846_s26, %s1132_s20 }
 0x362   : > { %p848_p5 = pnand %p847_p2, %p1038_p12 }
 0x363   : > { %p853_p4 = por %p852_p1, %p851_p11 }
 0x364   : > { %p849_p0 = pneg %p848_p5 }
 0x365   : > { %p855_p8 = por %p854_p6, %p853_p4 }
 0x367   : > { %p856_p10 = pnand %p855_p8, %p849_p0 }
 0x369   : > { %859 = shalt.err (!%p856_p10)
}
 0x36a   : > { %696 = dma.vmem_to_hbm [thread:$0]  (%p1038_p12), %s1127_s29, 128, %s1132_s20, %s516_s8  }
 0x36b PF: > { %s541_s10 = sand.u32 1, %s890_s21   ;;  %p1195_p13 = scmp.ne.s32.totalorder %s1185_s28, 0 }
 0x36c   : > { %p1196_p3 = scmp.ge.s32.totalorder %s902_s24, 2  ;;  %s542_s11 = scalar_lea.sflag [#allocation4], %s541_s10 }
 0x36e   : > { %p707_p7 = pnand %p1196_p3, %p1195_p13 }
 0x370   : > { %885 = dma.done.wait (!%p707_p7), %s542_s11, 128  }
 0x371   : > { %887 = vsyncadd (!%p707_p7), %s542_s11, 4294967168  ;;  %p20_p9 = scmp.ge.s32.totalorder %s1003_s9, 4   ;;  %s1197_s21 = smov %s894_s22 }
 0x372   : > { %s1198_s22 = smov %s898_s23  ;;  %s1199_s23 = smov %s1034_s13 }
 0x373   : > { %s1200_s24 = smov %s1003_s9  ;;  %22 = sbr.rel (!%p20_p9) target bundleno = 6 (0x6), region = 99 }
 0x37a   :  { %547 = vsyncpa [#allocation3], 1 }
 0x37b   :  { %549 = vsyncpa [#allocation3 + $0x1], 1 }
 0x37c   :  { %550 = vsyncpa [#allocation6], 1 }
 0x37d   :  { %551 = vsyncpa [#allocation4], 1 }
 0x37e   :  { %553 = vsyncpa [#allocation4 + $0x1], 1 }

</bundles_post_ra>
